<compile_context>
chip_gen: v7x
topology: tpu7x:2x2x1
jax: 0.10.0
libtpu: 0.0.40
codegen_flags: <defaults>
</compile_context>

<pallas_src>
import math
import jax
import jax.numpy as jnp
import numpy as np
from jax.experimental import pallas as pl
from jax.experimental.pallas import tpu as pltpu


def _round_up(x, m):
    return (x + m - 1) // m * m


def _chip_plan():
    """Return (vmem_target_bytes, vmem_limit_cap_bytes, num_parallel) per chip gen."""
    cap = None
    try:
        info = pltpu.get_tpu_info()
        cap = int(getattr(info, "vmem_capacity_bytes", 0)) or None
    except Exception:
        cap = None
    if cap is None:
        cap = 64 << 20  # conservative fallback: assume v7x-class 64 MiB / TC
    if cap <= (80 << 20):
        # v7x-class: 64 MiB VMEM per TensorCore, 2 TCs per chip -> shard the grid,
        # but keep the working set well under the 64 MiB scoped ceiling.
        return 24 << 20, 44 << 20, 2
    # v5e / v6e: 128 MiB VMEM, single TensorCore -> no parallel axis, big tiles.
    return 56 << 20, 100 << 20, 1


def _make_mqe_kernel(num_layers, compute_dtype):
    """Kernel factory. Ref order: keys, values, [W_0, b_0, ..., W_{L-1}, b_{L-1}], out."""

    def kernel(*refs):
        keys_ref, values_ref = refs[0], refs[1]
        wb = refs[2:2 + 2 * num_layers]
        out_ref = refs[2 + 2 * num_layers]

        s = pl.program_id(1)  # reduction axis (sequence tiles)

        # Output block index is constant along s, so the (1, hidden, Dv) tile stays
        # VMEM-resident: accumulate into it directly (no scratch, no epilogue copy).
        @pl.when(s == 0)
        def _():
            out_ref[...] = jnp.zeros_like(out_ref)

        # FFNN: stacked Linear + ReLU (dropout is identity in eval mode).
        # MXU inputs stay in compute_dtype (bf16); bias/ReLU math and all
        # accumulation stay in f32.
        h = keys_ref[...]
        for l in range(num_layers):
            w = wb[2 * l][...]          # (in, hidden), compute_dtype
            b = wb[2 * l + 1][...]      # (1, hidden), f32
            h = jnp.maximum(
                jnp.dot(h, w, preferred_element_type=jnp.float32) + b, 0.0)
            h = h.astype(compute_dtype)

        # Reassociated tail: G[k, d] += sum_s h[s, k] * values[s, d]
        # bf16 x bf16 MXU contraction with K = tile (the big streamed dim),
        # f32 accumulation into the resident output tile.
        g = jax.lax.dot_general(
            h, values_ref[...],
            dimension_numbers=(((0,), (0,)), ((), ())),
            preferred_element_type=jnp.float32)
        out_ref[...] += g[None]

    return kernel


def multi_query_encoder(keys, values, ffnn_weights, ffnn_biases,
                        query_vectors, query_ids, *,
                        seq_tile=None, num_parallel=None,
                        stream_buffer_bytes=3 << 20,
                        compute_dtype=jnp.bfloat16):
    """Pallas-backed MultiQueryEncoder.forward (eval mode).

    keys: (S, D) f32, values: (S, Dv) f32, weights stored (in, out),
    biases (1, hidden), query_vectors (hidden, num_queries).
    Returns (len(query_ids), Dv) f32.
    """
    S, D = keys.shape
    Dv = values.shape[1]
    num_layers = len(ffnn_weights)
    hidden = int(ffnn_weights[-1].shape[1])

    vmem_target, vmem_limit_cap, auto_parallel = _chip_plan()
    if num_parallel is None:
        num_parallel = auto_parallel

    itemsize = jnp.dtype(compute_dtype).itemsize
    param_bytes = (sum(int(np.prod(w.shape)) for w in ffnn_weights) * itemsize
                   + sum(int(np.prod(b.shape)) for b in ffnn_biases) * 4)
    widest_act = max([D] + [int(w.shape[1]) for w in ffnn_weights])

    def _vmem_budget(tile):
        stream = 2 * tile * (D + Dv) * itemsize   # double-buffered keys+values tiles
        invariants = 2 * param_bytes              # pipeline double-buffers W/b too
        out = 2 * hidden * Dv * 4                 # resident G accumulator
        # in-kernel temporaries: widest live activation (f32 dot output + bf16 copy)
        temps = tile * widest_act * (4 + itemsize)
        return stream + invariants + out + temps

    # Sequence tiling: (parallel halves) x (streaming reduction tiles).
    # Target ~stream_buffer_bytes per streamed buffer so per-step overhead is
    # amortized, then shrink until the full working set fits the VMEM target.
    per_core = pl.cdiv(S, num_parallel)
    row_bytes = (D + Dv) * itemsize
    target_rows = max(8, (stream_buffer_bytes // row_bytes) // 8 * 8)
    eff_tile = min(_round_up(per_core, 8), int(target_rows))
    if seq_tile is not None:
        eff_tile = min(eff_tile, _round_up(int(seq_tile), 8))
    eff_tile = max(8, eff_tile)
    while _vmem_budget(eff_tile) > vmem_target and eff_tile > 8:
        eff_tile = max(8, _round_up(eff_tile // 2, 8))

    vmem_limit = int(min(max(int(1.5 * _vmem_budget(eff_tile)) + (8 << 20), 32 << 20),
                         vmem_limit_cap))

    tiles_per_core = pl.cdiv(per_core, eff_tile)
    S_pad = num_parallel * tiles_per_core * eff_tile

    # Ragged-S handling: zero-pad. Padded *value* rows are zero, so they
    # contribute nothing to the sum over the sequence regardless of scores.
    if S_pad != S:
        keys = jnp.pad(keys, ((0, S_pad - S), (0, 0)))
        values = jnp.pad(values, ((0, S_pad - S), (0, 0)))

    # bf16 streaming of large operands; f32 accumulation is kept in-kernel.
    keys = keys.astype(compute_dtype)
    values = values.astype(compute_dtype)
    ws = [w.astype(compute_dtype) for w in ffnn_weights]
    bs = [b.astype(jnp.float32) for b in ffnn_biases]

    grid = (num_parallel, tiles_per_core)

    def seq_map(p, s):
        return (p * tiles_per_core + s, 0)

    in_specs = [
        pl.BlockSpec((eff_tile, D), seq_map),     # keys tile
        pl.BlockSpec((eff_tile, Dv), seq_map),    # values tile
    ]
    args = [keys, values]
    for w, b in zip(ws, bs):
        # TODO(synk): grid-invariant W/b are still double-buffered by the pipeline;
        # for very deep/wide FFNNs a single-buffered (pl.Buffered(1)) or scratch
        # preload path would free 2*param_bytes of VMEM headroom.
        in_specs.append(pl.BlockSpec(w.shape, lambda p, s: (0, 0)))
        in_specs.append(pl.BlockSpec(b.shape, lambda p, s: (0, 0)))
        args.append(w)
        args.append(b)

    kernel = _make_mqe_kernel(num_layers, compute_dtype)

    partials = pl.pallas_call(
        kernel,
        out_shape=jax.ShapeDtypeStruct((num_parallel, hidden, Dv), jnp.float32),
        grid_spec=pltpu.PrefetchScalarGridSpec(
            num_scalar_prefetch=0,
            grid=grid,
            in_specs=in_specs,
            out_specs=pl.BlockSpec((1, hidden, Dv), lambda p, s: (p, 0, 0)),
        ),
        compiler_params=pltpu.CompilerParams(
            dimension_semantics=("parallel", "arbitrary"),
            vmem_limit_bytes=vmem_limit),
    )(*args)

    # Tiny epilogue in the wrapper (f32): sum per-half partials, then apply the
    # selected query vectors once:  enc[q, d] = sum_k q_sel[k, q] * G[k, d].
    g_full = partials.sum(axis=0)                                  # (hidden, Dv)
    q_sel = query_vectors[:, query_ids].astype(jnp.float32)        # (hidden, nq)
    return jnp.dot(q_sel.T, g_full, preferred_element_type=jnp.float32)


def init_params(key, dimension, num_queries, hidden_size, num_layers):
    """Deterministic synthetic parameter init (mirrors PyTorch default inits)."""
    ws, bs = [], []
    in_size = dimension
    for _ in range(num_layers):
        key, kw, kb = jax.random.split(key, 3)
        bound = 1.0 / math.sqrt(in_size)
        # stored as (in, out) so the kernel can do x @ W directly
        ws.append(jax.random.uniform(kw, (in_size, hidden_size),
                                     jnp.float32, -bound, bound))
        bs.append(jax.random.uniform(kb, (1, hidden_size),
                                     jnp.float32, -bound, bound))
        in_size = hidden_size
    key, kq = jax.random.split(key)
    a = 1.0 / math.sqrt(hidden_size)
    query_vectors = jax.random.uniform(kq, (hidden_size, num_queries),
                                       jnp.float32, -a, a)
    return ws, bs, query_vectors


def _ref_forward_f32(keys, values, ws, bs, query_vectors, query_ids):
    """Pure f32 reference matching the PyTorch module's forward exactly."""
    h = keys
    for w, b in zip(ws, bs):
        h = jnp.maximum(jnp.dot(h, w) + b, 0.0)
    scores = jnp.dot(h, query_vectors[:, query_ids])    # (S, nq)
    return jnp.einsum("sq,sd->qd", scores, values)      # (nq, Dv)


if __name__ == "__main__":
    # small shapes consistent with the module's forward
    dimension = 32       # key feature dim
    hidden_size = 32     # FFNN hidden size
    num_layers = 2
    num_queries = 4
    S = 200              # deliberately not a multiple of the tile (ragged path)
    Dv = 64              # value feature dim

    key = jax.random.PRNGKey(0)
    key, kk, kv = jax.random.split(key, 3)
    keys = jax.random.normal(kk, (S, dimension), jnp.float32)
    values = jax.random.normal(kv, (S, Dv), jnp.float32)
    ws, bs, query_vectors = init_params(key, dimension, num_queries,
                                        hidden_size, num_layers)
    query_ids = jnp.array([2, 0, 3], dtype=jnp.int32)   # nq=3

    out = multi_query_encoder(keys, values, ws, bs, query_vectors, query_ids)
    out = jax.block_until_ready(out)

    # Compare against the exact f32 module semantics; bf16 streaming (documented
    # precision choice) gives ~1e-2-scale errors on O(1) encodings.
    ref = np.asarray(_ref_forward_f32(keys, values, ws, bs, query_vectors, query_ids))
    out_np = np.asarray(out)
    rel_l2 = np.linalg.norm(out_np - ref) / max(np.linalg.norm(ref), 1e-12)
    assert rel_l2 < 3e-2, f"relative L2 error too large: {rel_l2}"
    np.testing.assert_allclose(out_np, ref, rtol=1e-1, atol=1e-1)
    print("KERNEL_OK")
</pallas_src>

<mosaic_0001>
module attributes {stable_mosaic.version = 11 : i64} {
  func.func @kernel(%arg0: i32, %arg1: i32, %arg2: memref<104x32xbf16, #tpu.memory_space<vmem>>, %arg3: memref<104x64xbf16, #tpu.memory_space<vmem>>, %arg4: memref<32x32xbf16, #tpu.memory_space<vmem>>, %arg5: memref<1x32xf32, #tpu.memory_space<vmem>>, %arg6: memref<32x32xbf16, #tpu.memory_space<vmem>>, %arg7: memref<1x32xf32, #tpu.memory_space<vmem>>, %arg8: memref<1x32x64xf32, #tpu.memory_space<vmem>>) attributes {dimension_semantics = [#tpu.dimension_semantics<parallel>, #tpu.dimension_semantics<arbitrary>], iteration_bounds = array<i64: 2, 1>, scalar_prefetch = 0 : i64, scratch_operands = 0 : i64, tpu.core_type = #tpu.core_type<tc>, window_params = [{transform_indices = @transform_0, window_bounds = array<i64: 104, 32>}, {transform_indices = @transform_1, window_bounds = array<i64: 104, 64>}, {pipeline_mode = #tpu.pipeline_mode<synchronous>, transform_indices = @transform_2, window_bounds = array<i64: 32, 32>}, {pipeline_mode = #tpu.pipeline_mode<synchronous>, transform_indices = @transform_3, window_bounds = array<i64: 1, 32>}, {pipeline_mode = #tpu.pipeline_mode<synchronous>, transform_indices = @transform_4, window_bounds = array<i64: 32, 32>}, {pipeline_mode = #tpu.pipeline_mode<synchronous>, transform_indices = @transform_5, window_bounds = array<i64: 1, 32>}, {transform_indices = @transform_6, window_bounds = array<i64: 1, 32, 64>}]} {
    %c0_i32 = arith.constant 0 : i32
    %0 = arith.cmpi eq, %arg1, %c0_i32 : i32
    %1 = arith.extui %0 : i1 to i32
    %c0_i32_0 = arith.constant 0 : i32
    %2 = arith.cmpi ne, %1, %c0_i32_0 : i32
    scf.if %2 {
      %cst_22 = arith.constant 0.000000e+00 : f32
      %26 = vector.broadcast %cst_22 : f32 to vector<1x32x64xf32>
      %c0_23 = arith.constant 0 : index
      %c0_24 = arith.constant 0 : index
      %c0_25 = arith.constant 0 : index
      %27 = vector.load %arg8[%c0_23, %c0_24, %c0_25] : memref<1x32x64xf32, #tpu.memory_space<vmem>>, vector<1x32x64xf32>
      tpu.vector_store %arg8[%c0_23, %c0_24, %c0_25], %26 {strides = array<i32>} : memref<1x32x64xf32, #tpu.memory_space<vmem>>, vector<1x32x64xf32>,
    } else {
    }
    %c0 = arith.constant 0 : index
    %c0_1 = arith.constant 0 : index
    %3 = vector.load %arg2[%c0, %c0_1] : memref<104x32xbf16, #tpu.memory_space<vmem>>, vector<104x32xbf16>
    %c0_2 = arith.constant 0 : index
    %c0_3 = arith.constant 0 : index
    %4 = vector.load %arg4[%c0_2, %c0_3] : memref<32x32xbf16, #tpu.memory_space<vmem>>, vector<32x32xbf16>
    %c0_4 = arith.constant 0 : index
    %c0_5 = arith.constant 0 : index
    %5 = vector.load %arg5[%c0_4, %c0_5] : memref<1x32xf32, #tpu.memory_space<vmem>>, vector<1x32xf32>
    %cst = arith.constant dense<0.000000e+00> : vector<104x32xf32>
    %6 = tpu.matmul %3, %4, %cst {dimension_numbers = #tpu.dot_dimension_numbers<[1], [0], [0], [1], [0, 0, 1, 1], [], []>} : vector<104x32xbf16>, vector<32x32xbf16>, vector<104x32xf32> -> vector<104x32xf32>
    %7 = vector.broadcast %5 : vector<1x32xf32> to vector<104x32xf32>
    %8 = arith.addf %6, %7 : vector<104x32xf32>
    %cst_6 = arith.constant 0.000000e+00 : f32
    %9 = vector.broadcast %cst_6 : f32 to vector<104x32xf32>
    %10 = arith.maximumf %8, %9 : vector<104x32xf32>
    %11 = arith.truncf %10 : vector<104x32xf32> to vector<104x32xbf16>
    %c0_7 = arith.constant 0 : index
    %c0_8 = arith.constant 0 : index
    %12 = vector.load %arg6[%c0_7, %c0_8] : memref<32x32xbf16, #tpu.memory_space<vmem>>, vector<32x32xbf16>
    %c0_9 = arith.constant 0 : index
    %c0_10 = arith.constant 0 : index
    %13 = vector.load %arg7[%c0_9, %c0_10] : memref<1x32xf32, #tpu.memory_space<vmem>>, vector<1x32xf32>
    %cst_11 = arith.constant dense<0.000000e+00> : vector<104x32xf32>
    %14 = tpu.matmul %11, %12, %cst_11 {dimension_numbers = #tpu.dot_dimension_numbers<[1], [0], [0], [1], [0, 0, 1, 1], [], []>} : vector<104x32xbf16>, vector<32x32xbf16>, vector<104x32xf32> -> vector<104x32xf32>
    %15 = vector.broadcast %13 : vector<1x32xf32> to vector<104x32xf32>
    %16 = arith.addf %14, %15 : vector<104x32xf32>
    %cst_12 = arith.constant 0.000000e+00 : f32
    %17 = vector.broadcast %cst_12 : f32 to vector<104x32xf32>
    %18 = arith.maximumf %16, %17 : vector<104x32xf32>
    %19 = arith.truncf %18 : vector<104x32xf32> to vector<104x32xbf16>
    %c0_13 = arith.constant 0 : index
    %c0_14 = arith.constant 0 : index
    %20 = vector.load %arg3[%c0_13, %c0_14] : memref<104x64xbf16, #tpu.memory_space<vmem>>, vector<104x64xbf16>
    %cst_15 = arith.constant dense<0.000000e+00> : vector<32x64xf32>
    %21 = tpu.matmul %19, %20, %cst_15 {dimension_numbers = #tpu.dot_dimension_numbers<[0], [0], [1], [1], [0, 1, 1, 1], [], []>} : vector<104x32xbf16>, vector<104x64xbf16>, vector<32x64xf32> -> vector<32x64xf32>
    %c0_16 = arith.constant 0 : index
    %c0_17 = arith.constant 0 : index
    %c0_18 = arith.constant 0 : index
    %22 = vector.load %arg8[%c0_16, %c0_17, %c0_18] : memref<1x32x64xf32, #tpu.memory_space<vmem>>, vector<1x32x64xf32>
    %23 = vector.shape_cast %21 : vector<32x64xf32> to vector<1x32x64xf32>
    %24 = arith.addf %22, %23 : vector<1x32x64xf32>
    %c0_19 = arith.constant 0 : index
    %c0_20 = arith.constant 0 : index
    %c0_21 = arith.constant 0 : index
    %25 = vector.load %arg8[%c0_19, %c0_20, %c0_21] : memref<1x32x64xf32, #tpu.memory_space<vmem>>, vector<1x32x64xf32>
    tpu.vector_store %arg8[%c0_19, %c0_20, %c0_21], %24 {strides = array<i32>} : memref<1x32x64xf32, #tpu.memory_space<vmem>>, vector<1x32x64xf32>,
    return
  }
  func.func @transform_0(%arg0: i32, %arg1: i32) -> (i32, i32) {
    %c1_i32 = arith.constant 1 : i32
    %0 = arith.muli %arg0, %c1_i32 : i32
    %1 = arith.addi %0, %arg1 : i32
    %c0_i32 = arith.constant 0 : i32
    %c0_i32_0 = arith.constant 0 : i32
    return %1, %c0_i32 : i32, i32
  }
  func.func @transform_1(%arg0: i32, %arg1: i32) -> (i32, i32) {
    %c1_i32 = arith.constant 1 : i32
    %0 = arith.muli %arg0, %c1_i32 : i32
    %1 = arith.addi %0, %arg1 : i32
    %c0_i32 = arith.constant 0 : i32
    %c0_i32_0 = arith.constant 0 : i32
    return %1, %c0_i32 : i32, i32
  }
  func.func @transform_2(%arg0: i32, %arg1: i32) -> (i32, i32) {
    %c0_i32 = arith.constant 0 : i32
    %c0_i32_0 = arith.constant 0 : i32
    %c0_i32_1 = arith.constant 0 : i32
    return %c0_i32, %c0_i32_0 : i32, i32
  }
  func.func @transform_3(%arg0: i32, %arg1: i32) -> (i32, i32) {
    %c0_i32 = arith.constant 0 : i32
    %c0_i32_0 = arith.constant 0 : i32
    %c0_i32_1 = arith.constant 0 : i32
    return %c0_i32, %c0_i32_0 : i32, i32
  }
  func.func @transform_4(%arg0: i32, %arg1: i32) -> (i32, i32) {
    %c0_i32 = arith.constant 0 : i32
    %c0_i32_0 = arith.constant 0 : i32
    %c0_i32_1 = arith.constant 0 : i32
    return %c0_i32, %c0_i32_0 : i32, i32
  }
  func.func @transform_5(%arg0: i32, %arg1: i32) -> (i32, i32) {
    %c0_i32 = arith.constant 0 : i32
    %c0_i32_0 = arith.constant 0 : i32
    %c0_i32_1 = arith.constant 0 : i32
    return %c0_i32, %c0_i32_0 : i32, i32
  }
  func.func @transform_6(%arg0: i32, %arg1: i32) -> (i32, i32, i32) {
    %c0_i32 = arith.constant 0 : i32
    %c0_i32_0 = arith.constant 0 : i32
    %c0_i32_1 = arith.constant 0 : i32
    return %arg0, %c0_i32, %c0_i32_0 : i32, i32, i32
  }
}

</mosaic_0001>

<bundles_post_ra>
// kernel: tpu_custom_call.1
= control target key start
LH: loop header
LB: loop body
LE: loop exit
PB: predicated region body
PF: predicated region fallthrough
CT: control target
= control target key end

     0   :  { %11 = vsyncpa [#allocation3], 0  ;;  %s1505_s0 = inlined_call_operand.vmem [shape: bf16[208,32], index: 0, kind: input, shape index: {}]   ;;  %s1506_s1 = inlined_call_operand.vmem [shape: bf16[208,64], index: 1, kind: input, shape index: {}]   ;;  %s1507_s2 = inlined_call_operand.vmem [shape: bf16[32,32], index: 2, kind: input, shape index: {}]   ;;  %s1508_s3 = inlined_call_operand.vmem [shape: f32[1,32], index: 3, kind: input, shape index: {}]   ;;  %s1509_s4 = inlined_call_operand.vmem [shape: bf16[32,32], index: 4, kind: input, shape index: {}]   ;;  %s1510_s5 = inlined_call_operand.vmem [shape: f32[1,32], index: 5, kind: input, shape index: {}]   ;;  %s1511_s6 = inlined_call_operand.hbm [shape: f32[2,32,64], index: 6, kind: output, shape index: {}]  }
   0x1   :  { %13 = vsyncpa [#allocation3 + $0x1], 0  ;;  %s1256_s21 = smov 0   ;;  %s1258_s22 = smov 0  }
   0x2   :  { %s1260_s23 = smov 0   ;;  %s1262_s24 = smov 0  }
   0x3   :  { %s1264_s25 = smov 0   ;;  %s1266_s26 = smov 0  }
   0x4 LB: > { %s898_s27 = sadd.s32 4294967295, %s1214_s26   ;;  %s899_s28 = sadd.s32 4294967294, %s1214_s26   ;;  %s1214_s26 = sphi %s1266_s26, %s19_s26   ;;  %s1210_s25 = sphi %s1264_s25, %s1518_s25   ;;  %s1206_s24 = sphi %s1262_s24, %s1517_s24   ;;  %s1202_s23 = sphi %s1260_s23, %s1516_s23   ;;  %s1198_s22 = sphi %s1258_s22, %s1515_s22   ;;  %s1194_s21 = sphi %s1256_s21, %s1514_s21  }
   0x5   : > { %s31_s29 = sadd.s32 1, %s1210_s25  ;;  %s178_s30 = sadd.s32 1, %s1202_s23 }
   0x6   : > { %p33_p0 = scmp.ge.s32.totalorder %s31_s29, 2  ;;  %p188_p1 = scmp.ne.s32.totalorder %s1202_s23, %s1198_s22 }
   0x7   : > { %p189_p2 = scmp.eq.s32.totalorder %s898_s27, 1  ;;  %p194_p3 = scmp.ne.s32.totalorder %s1198_s22, %s1194_s21 }
   0x8   : > { %s1520_s29 = smov (%p33_p0, %s31_s29), 0  ;;  %p195_p5 = scmp.eq.s32.totalorder %s899_s28, 1 }
   0x9   : > { %p1296_p4 = por %p189_p2, %p188_p1  ;;  %s175_s8 = ssub.s32 %s1210_s25, %s1520_s29 }
   0xa   : > { %p902_p6 = scmp.ge.s32.totalorder %s1214_s26, 1  ;;  %p176_p7 = scmp.eq.s32.totalorder %s175_s8, 0 }
   0xb   : > { %p1303_p8 = por %p195_p5, %p194_p3  ;;  %p247_p9 = scmp.lt.s32.totalorder %s1214_s26, 3 }
   0xc   : > { %s1309_s10 = scalar_select %p176_p7, %s1202_s23, %s178_s30  }
   0xd   : > { %p248_p10 = pnand %p902_p6, %p247_p9 }
   0xe   : > { %v1118_v0 = vld [vmem:[%s1507_s2] sm:$0xff] (!%p248_p10)   ;;  %v1216_v1 = vmov (!%p248_p10), 0.0   ;;  %v1119_v2 = vld [vmem:[%s1507_s2 + $0x8] sm:$0xff] (!%p248_p10)   ;;  %vm1217_vm0 = vmmov (!%p248_p10), 0   ;;  %s285_s15 = smul.u32 (!%p248_p10), 13, %s1206_s24  ;;  %vm379_vm1 = vcmask (!%p248_p10), 261120  }
   0xf   : > { %251 = sbr.rel (%p248_p10) target bundleno = 827 (0x33b), region = 44  ;;  %975 = vmatprep.subr.bf16.mxu0 (!%p248_p10), %v1216_v1  ;;  %1007 = vmatprep.subr.bf16.mxu1 (!%p248_p10), %v1216_v1  ;;  %v1127_v10 = vld [vmem:[%s1509_s4] sm:$0xff] (!%p248_p10)   ;;  %v1128_v11 = vld [vmem:[%s1509_s4 + $0x8] sm:$0xff] (!%p248_p10)   ;;  %vm736_vm2 = vcmask (!%p248_p10), 1043456   ;;  %s281_s17 = sand.u32 (!%p248_p10), 1, %s1198_s22   ;;  %vm305_vm3 = vcmask (!%p248_p10), 523264  }
  0x10   : > { %976 = vmatpush3.bf16.msra.mxu0 (!%p248_p10), %v1118_v0  ;;  %979 = vmatprep.mubr.msk.bf16.mxu0 (!%p248_p10), %vm1217_vm0, %v1216_v1  ;;  %p286_p11 = scmp.lt.s32.totalorder (!%p248_p10), %s285_s15, 25  ;;  %v1362_v12 = vld [vmem:[%s1508_s3] ss:$0 sm:$0xff] (!%p248_p10)  ;;  %s903_s18 = sshll.u32 (!%p248_p10), %s281_s17, 5  ;;  %vm729_vm4 = vcmask (!%p248_p10), 850944  }
  0x11   : > { %977 = vmatprep.subr.bf16.mxu0 (!%p248_p10), %v1216_v1  ;;  %1011 = vmatprep.mubr.msk.bf16.mxu1 (!%p248_p10), %vm1217_vm0, %v1216_v1  ;;  %s947_s20 = sshll.u32 (!%p248_p10), %s1206_s24, 9  ;;  %s1459_s24 = scalar_lea.sflag (!%p248_p10), [#allocation3], %s281_s17 }
  0x12   : > { %1008 = vmatpush3.bf16.msra.mxu1 (!%p248_p10), %v1127_v10  ;;  %s1447_s8 = scalar_lea.hbm (!%p248_p10), %s1511_s6, %s947_s20  ;;  %s1218_s12 = smov (!%p248_p10), [#allocation2]  }
  0x13   : > { %1009 = vmatprep.subr.bf16.mxu1 (!%p248_p10), %v1216_v1  ;;  %s1140_s13 = sshll.u32 (!%p248_p10), %s1218_s12, 4  ;;  %s1141_s13 = int_to_ptr.vmem [resolvable:$false] %s1140_s13 }
  0x14   : > { %978 = vmatpush3.bf16.msra.mxu0 (!%p248_p10), %v1119_v2 }
  0x16   : > { %s1522_s15 = smov (!%p286_p11, %s285_s15), 25  ;;  %1010 = vmatpush3.bf16.msra.mxu1 %v1128_v11 }
  0x17   : > { %s904_s16 = sshll.u32 %s1522_s15, 2 }
  0x18   : > { %s289_s19 = scalar_lea.vmem %s1505_s0, %s904_s16  ;;  %s297_s14 = scalar_lea.vmem %s1506_s1, %s904_s16 }
  0x19   : > { %v1120_v3 = vld [vmem:[%s289_s19] sm:$0xff]   ;;  %v1121_v4 = vld [vmem:[%s289_s19 + $0x8] sm:$0xff]   ;;  %v1122_v5 = vld [vmem:[%s289_s19 + $0x10] sm:$0xff]  }
  0x1a   : > { %980 = vmatmul.mubr.msk.bf16.vlgmr.msra.gmra.mrb[0].mxu0 %vm379_vm1, %v1120_v3  ;;  %v1123_v6 = vld [vmem:[%s289_s19 + $0x18] sm:$0xff]   ;;  %v1124_v7 = vld [vmem:[%s289_s19 + $0x20] sm:$0xff]   ;;  %v1125_v8 = vld [vmem:[%s289_s19 + $0x28] sm:$0xff]  }
  0x1b   : > { %983 = vmatprep.mubr.msk.bf16.mxu0 %vm1217_vm0, %v1216_v1  ;;  %v1126_v9 = vld [vmem:[%s289_s19 + $0x30] ss:$0 sps:$4 sm:$0xff]   ;;  %v1129_v11 = vld [vmem:[%s297_s14] sm:$0xff]   ;;  %s1413_s19 = scalar_lea.vmem [#allocation2], %s903_s18 }
  0x1c   : > { %1039 = vmatprep.subr.bf16.mxu0 %v1129_v11  ;;  %308 = vst.msk [vmem:[%s1413_s19 + $0x10] sm:$0xff] %vm305_vm3, %v1216_v1  ;;  %306 = vst.msk [vmem:[%s1413_s19] sm:$0xff] %vm305_vm3, %v1216_v1  ;;  %s816_s27 = sshll.u32 %s1413_s19, 4  ;;  %s1449_s27 = int_to_ptr.vmem [resolvable:$true] %s816_s27 }
  0x1d   : > { %1040 = vmatpush3.bf16.msra.mxu0 %v1129_v11  ;;  %307 = vst.msk [vmem:[%s1413_s19 + $0x8] sm:$0xff] %vm305_vm3, %v1216_v1  ;;  %309 = vst.msk [vmem:[%s1413_s19 + $0x18] sm:$0xff] %vm305_vm3, %v1216_v1  ;;  %s1136_s11 = scalar_lea.vmem %s1449_s27, 512  ;;  %p1143_p1 = scmp.lt.s32.totalorder %s1449_s27, %s1141_s13 }
  0x1e   : > { %p1137_p12 = scmp.ne.s32.totalorder %s1449_s27, %s1136_s11 }
  0x20   : > { %p1138_p13 = pnand %p1137_p12, %p1296_p4 }
  0x22   : > { %984 = vmatmul.mubr.msk.bf16.gmra.mrb[4].mxu0 %vm379_vm1, %v1121_v4  ;;  %p1139_p0 = pneg %p1138_p13 }
  0x23   : > { %987 = vmatprep.mubr.msk.bf16.mxu0 %vm1217_vm0, %v1216_v1 }
  0x2a   : > { %988 = vmatmul.mubr.msk.bf16.gmra.mrb[8].mxu0 %vm379_vm1, %v1122_v5 }
  0x2b   : > { %991 = vmatprep.mubr.msk.bf16.mxu0 %vm1217_vm0, %v1216_v1 }
  0x32   : > { %992 = vmatmul.mubr.msk.bf16.gmra.mrb[12].mxu0 %vm379_vm1, %v1123_v6 }
  0x33   : > { %995 = vmatprep.mubr.msk.bf16.mxu0 %vm1217_vm0, %v1216_v1 }
  0x3a   : > { %996 = vmatmul.mubr.msk.bf16.gmra.mrb[16].mxu0 %vm379_vm1, %v1124_v7 }
  0x3b   : > { %999 = vmatprep.mubr.msk.bf16.mxu0 %vm1217_vm0, %v1216_v1 }
  0x42   : > { %1000 = vmatmul.mubr.msk.bf16.gmra.mrb[20].mxu0 %vm379_vm1, %v1125_v8 }
  0x43   : > { %1003 = vmatprep.mubr.msk.bf16.mxu0 %vm1217_vm0, %v1216_v1 }
  0x4a   : > { %1004 = vmatmul.mubr.msk.bf16.gmra.mrb[24].mxu0 %vm379_vm1, %v1126_v9 }
  0xed   : > { %v435_v13 = vpop.f32.mrb[0].mxu0 }
  0xee   : > { %v436_v14 = vadd.f32 %v1362_v12, %v435_v13  ;;  %v981_v15 = vpop.f32.mrb[1].mxu0  ;;  %v1130_v13 = vld [vmem:[%s297_s14 + $0x8] sm:$0xff]  }
  0xef   : > { %v438_v16 = vpop.f32.mrb[2].mxu0  ;;  %1041 = vmatprep.subr.bf16.mxu0 %v1130_v13  ;;  %v1133_v15 = vld [vmem:[%s297_s14 + $0x20] sm:$0xff]  }
  0xf0   : > { %v439_v17 = vadd.f32 %v1362_v12, %v438_v16  ;;  %v982_v18 = vpop.f32.mrb[3].mxu0  ;;  %v489_v19 = vmax.f32 %v436_v14, 0.0  ;;  %1042 = vmatpush3.bf16.msra.mxu0 %v1130_v13  ;;  %v1132_v14 = vld [vmem:[%s297_s14 + $0x18] sm:$0xff]   ;;  %v1134_v16 = vld [vmem:[%s297_s14 + $0x28] sm:$0xff]  }
  0xf2   : > { %v490_v20 = vmax.f32 %v439_v17, 0.0  ;;  %v1135_v17 = vld [vmem:[%s297_s14 + $0x30] ss:$0 sps:$4 sm:$0xff]  }
  0xf3   : > { %v738_v18 = vsel %vm736_vm2, %v1135_v17, 0 }
  0xf4   : > { %v502_v21 = vpack.c.bf16 %v490_v20, %v489_v19  ;;  %v1404_v19 = vld [vmem:[%s1510_s5] ss:$0 sm:$0xff] }
  0xf5   : > { %v443_v22 = vpop.f32.mrb[4].mxu0 }
  0xf6   : > { %v444_v23 = vadd.f32 %v1362_v12, %v443_v22  ;;  %v985_v24 = vpop.f32.mrb[5].mxu0  ;;  %1012 = vmatmul.mubr.msk.bf16.vlgmr.msra.gmra.mrb[0].mxu1 %vm379_vm1, %v502_v21 }
  0xf7   : > { %v446_v25 = vpop.f32.mrb[6].mxu0  ;;  %1015 = vmatprep.mubr.msk.bf16.mxu1 %vm1217_vm0, %v1216_v1 }
  0xf8   : > { %v447_v26 = vadd.f32 %v1362_v12, %v446_v25  ;;  %v986_v27 = vpop.f32.mrb[7].mxu0  ;;  %v491_v28 = vmax.f32 %v444_v23, 0.0 }
  0xfa   : > { %v492_v29 = vmax.f32 %v447_v26, 0.0 }
  0xfc   : > { %v503_v30 = vpack.c.bf16 %v492_v29, %v491_v28 }
  0xfd   : > { %v451_v31 = vpop.f32.mrb[8].mxu0 }
  0xfe   : > { %v452_v32 = vadd.f32 %v1362_v12, %v451_v31  ;;  %v989_v33 = vpop.f32.mrb[9].mxu0  ;;  %1016 = vmatmul.mubr.msk.bf16.gmra.mrb[4].mxu1 %vm379_vm1, %v503_v30 }
  0xff   : > { %v454_v34 = vpop.f32.mrb[10].mxu0  ;;  %1019 = vmatprep.mubr.msk.bf16.mxu1 %vm1217_vm0, %v1216_v1 }
 0x100   : > { %v455_v35 = vadd.f32 %v1362_v12, %v454_v34  ;;  %v990_v36 = vpop.f32.mrb[11].mxu0  ;;  %v493_v37 = vmax.f32 %v452_v32, 0.0 }
 0x102   : > { %v494_v38 = vmax.f32 %v455_v35, 0.0 }
 0x104   : > { %v504_v39 = vpack.c.bf16 %v494_v38, %v493_v37 }
 0x105   : > { %v459_v40 = vpop.f32.mrb[12].mxu0 }
 0x106   : > { %v460_v41 = vadd.f32 %v1362_v12, %v459_v40  ;;  %v993_v42 = vpop.f32.mrb[13].mxu0  ;;  %1020 = vmatmul.mubr.msk.bf16.gmra.mrb[8].mxu1 %vm379_vm1, %v504_v39 }
 0x107   : > { %v462_v43 = vpop.f32.mrb[14].mxu0  ;;  %1023 = vmatprep.mubr.msk.bf16.mxu1 %vm1217_vm0, %v1216_v1 }
 0x108   : > { %v463_v44 = vadd.f32 %v1362_v12, %v462_v43  ;;  %v994_v45 = vpop.f32.mrb[15].mxu0  ;;  %v495_v46 = vmax.f32 %v460_v41, 0.0 }
 0x10a   : > { %v496_v47 = vmax.f32 %v463_v44, 0.0 }
 0x10c   : > { %v505_v48 = vpack.c.bf16 %v496_v47, %v495_v46 }
 0x10d   : > { %v467_v49 = vpop.f32.mrb[16].mxu0 }
 0x10e   : > { %v468_v50 = vadd.f32 %v1362_v12, %v467_v49  ;;  %v997_v51 = vpop.f32.mrb[17].mxu0  ;;  %1024 = vmatmul.mubr.msk.bf16.gmra.mrb[12].mxu1 %vm379_vm1, %v505_v48 }
 0x10f   : > { %v470_v52 = vpop.f32.mrb[18].mxu0  ;;  %1027 = vmatprep.mubr.msk.bf16.mxu1 %vm1217_vm0, %v1216_v1 }
 0x110   : > { %v471_v53 = vadd.f32 %v1362_v12, %v470_v52  ;;  %v998_v54 = vpop.f32.mrb[19].mxu0  ;;  %v497_v55 = vmax.f32 %v468_v50, 0.0 }
 0x112   : > { %v498_v56 = vmax.f32 %v471_v53, 0.0 }
 0x114   : > { %v506_v57 = vpack.c.bf16 %v498_v56, %v497_v55 }
 0x115   : > { %v475_v58 = vpop.f32.mrb[20].mxu0 }
 0x116   : > { %v476_v59 = vadd.f32 %v1362_v12, %v475_v58  ;;  %v1001_v60 = vpop.f32.mrb[21].mxu0  ;;  %1028 = vmatmul.mubr.msk.bf16.gmra.mrb[16].mxu1 %vm379_vm1, %v506_v57 }
 0x117   : > { %v478_v61 = vpop.f32.mrb[22].mxu0  ;;  %1031 = vmatprep.mubr.msk.bf16.mxu1 %vm1217_vm0, %v1216_v1 }
 0x118   : > { %v479_v62 = vadd.f32 %v1362_v12, %v478_v61  ;;  %v1002_v63 = vpop.f32.mrb[23].mxu0  ;;  %v499_v0 = vmax.f32 %v476_v59, 0.0 }
 0x11a   : > { %v500_v2 = vmax.f32 %v479_v62, 0.0 }
 0x11c   : > { %v507_v3 = vpack.c.bf16 %v500_v2, %v499_v0 }
 0x11d   : > { %v483_v4 = vpop.f32.mrb[24].mxu0 }
 0x11e   : > { %v484_v5 = vadd.f32 %v1362_v12, %v483_v4  ;;  %v1005_v6 = vpop.f32.mrb[25].mxu0  ;;  %1032 = vmatmul.mubr.msk.bf16.gmra.mrb[20].mxu1 %vm379_vm1, %v507_v3  ;;  %v1131_v12 = vld [vmem:[%s297_s14 + $0x10] sm:$0xff]   ;;  %s1142_s14 = scalar_lea.vmem %s1141_s13, 1024 }
 0x11f   : > { %v486_v7 = vpop.f32.mrb[26].mxu0  ;;  %1035 = vmatprep.mubr.msk.bf16.mxu1 %vm1217_vm0, %v1216_v1  ;;  %1043 = vmatprep.subr.bf16.mxu0 %v1131_v12  ;;  %p1144_p2 = scmp.lt.s32.totalorder %s1142_s14, %s1136_s11 }
 0x120   : > { %v501_v8 = vmax.f32 %v484_v5, 0.0  ;;  %v1006_v9 = vpop.f32.mrb[27].mxu0  ;;  %1044 = vmatpush3.bf16.msra.mxu0 %v1131_v12 }
 0x121   : > { %1045 = vmatprep.subr.bf16.mxu0 %v1132_v14  ;;  %p1145_p3 = por %p1144_p2, %p1143_p1 }
 0x122   : > { %v508_v10 = vpack.c.bf16 %v501_v8, %v501_v8 }
 0x123   : > { %p1146_p5 = pnand %p1145_p3, %p1139_p0 }
 0x124   : > { %1046 = vmatpush3.bf16.msra.mxu0 %v1132_v14 }
 0x125   : > { %1047 = vmatprep.subr.bf16.mxu0 %v1133_v15 }
 0x126   : > { %1036 = vmatmul.mubr.msk.bf16.gmra.mrb[24].mxu1 %vm379_vm1, %v508_v10 }
 0x128   : > { %1048 = vmatpush3.bf16.msra.mxu0 %v1133_v15 }
 0x129   : > { %1049 = vmatprep.subr.bf16.mxu0 %v1134_v16 }
 0x12c   : > { %1050 = vmatpush3.bf16.msra.mxu0 %v1134_v16 }
 0x12d   : > { %1057 = vmatprep.subr.msk.bf16.mxu0 %vm736_vm2, %v1135_v17 }
 0x130   : > { %1052 = vmatpush3.bf16.msra.mxu0 %v738_v18 }
 0x1c9   : > { %v587_v20 = vpop.f32.mrb[0].mxu1 }
 0x1ca   : > { %v588_v21 = vadd.f32 %v1404_v19, %v587_v20  ;;  %v1013_v22 = vpop.f32.mrb[1].mxu1  ;;  %v791_v20 = vld [vmem:[%s1413_s19 + $0x10] sm:$0xff] }
 0x1cb   : > { %v590_v23 = vpop.f32.mrb[2].mxu1  ;;  %v792_v22 = vld [vmem:[%s1413_s19 + $0x18] sm:$0xff] }
 0x1cc   : > { %v591_v24 = vadd.f32 %v1404_v19, %v590_v23  ;;  %v1014_v25 = vpop.f32.mrb[3].mxu1  ;;  %v641_v26 = vmax.f32 %v588_v21, 0.0 }
 0x1cd   : > { %v790_v25 = vld [vmem:[%s1413_s19 + $0x8] sm:$0xff] }
 0x1ce   : > { %v642_v27 = vmax.f32 %v591_v24, 0.0 }
 0x1d0   : > { %v654_v28 = vpack.c.bf16 %v642_v27, %v641_v26 }
 0x1d1   : > { %v595_v29 = vpop.f32.mrb[4].mxu1 }
 0x1d2   : > { %v596_v30 = vadd.f32 %v1404_v19, %v595_v29  ;;  %674 = vxpose.xlu0.c.b16.start [1/7] (short) (narrow) %v654_v28, 32  ;;  %v1017_v31 = vpop.f32.mrb[5].mxu1 }
 0x1d3   : > { %v598_v32 = vpop.f32.mrb[6].mxu1 }
 0x1d4   : > { %v599_v33 = vadd.f32 %v1404_v19, %v598_v32  ;;  %v1018_v34 = vpop.f32.mrb[7].mxu1  ;;  %v643_v35 = vmax.f32 %v596_v30, 0.0 }
 0x1d6   : > { %v644_v36 = vmax.f32 %v599_v33, 0.0 }
 0x1d8   : > { %v655_v37 = vpack.c.bf16 %v644_v36, %v643_v35 }
 0x1d9   : > { %v603_v38 = vpop.f32.mrb[8].mxu1 }
 0x1da   : > { %v604_v39 = vadd.f32 %v1404_v19, %v603_v38  ;;  %675 = vxpose.xlu0.c.b16.cont [2/7] (short) (narrow) %v655_v37, 32  ;;  %v1021_v40 = vpop.f32.mrb[9].mxu1 }
 0x1db   : > { %v606_v41 = vpop.f32.mrb[10].mxu1 }
 0x1dc   : > { %v607_v42 = vadd.f32 %v1404_v19, %v606_v41  ;;  %v1022_v43 = vpop.f32.mrb[11].mxu1  ;;  %v645_v44 = vmax.f32 %v604_v39, 0.0 }
 0x1de   : > { %v646_v45 = vmax.f32 %v607_v42, 0.0 }
 0x1e0   : > { %v656_v46 = vpack.c.bf16 %v646_v45, %v645_v44 }
 0x1e1   : > { %v611_v47 = vpop.f32.mrb[12].mxu1 }
 0x1e2   : > { %v612_v48 = vadd.f32 %v1404_v19, %v611_v47  ;;  %676 = vxpose.xlu0.c.b16.cont [3/7] (short) (narrow) %v656_v46, 32  ;;  %v1025_v49 = vpop.f32.mrb[13].mxu1 }
 0x1e3   : > { %v614_v50 = vpop.f32.mrb[14].mxu1 }
 0x1e4   : > { %v615_v1 = vadd.f32 %v1404_v19, %v614_v50  ;;  %v1026_v51 = vpop.f32.mrb[15].mxu1  ;;  %v647_v52 = vmax.f32 %v612_v48, 0.0 }
 0x1e6   : > { %v648_v53 = vmax.f32 %v615_v1, 0.0 }
 0x1e8   : > { %v657_v54 = vpack.c.bf16 %v648_v53, %v647_v52 }
 0x1e9   : > { %v619_v55 = vpop.f32.mrb[16].mxu1 }
 0x1ea   : > { %v620_v56 = vadd.f32 %v1404_v19, %v619_v55  ;;  %677 = vxpose.xlu0.c.b16.cont [4/7] (short) (narrow) %v657_v54, 32  ;;  %v1029_v57 = vpop.f32.mrb[17].mxu1 }
 0x1eb   : > { %v622_v58 = vpop.f32.mrb[18].mxu1 }
 0x1ec   : > { %v623_v59 = vadd.f32 %v1404_v19, %v622_v58  ;;  %v1030_v60 = vpop.f32.mrb[19].mxu1  ;;  %v649_v61 = vmax.f32 %v620_v56, 0.0 }
 0x1ee   : > { %v650_v62 = vmax.f32 %v623_v59, 0.0 }
 0x1f0   : > { %v658_v63 = vpack.c.bf16 %v650_v62, %v649_v61 }
 0x1f1   : > { %v627_v0 = vpop.f32.mrb[20].mxu1 }
 0x1f2   : > { %v628_v2 = vadd.f32 %v1404_v19, %v627_v0  ;;  %678 = vxpose.xlu0.c.b16.cont [5/7] (short) (narrow) %v658_v63, 32  ;;  %v1033_v3 = vpop.f32.mrb[21].mxu1 }
 0x1f3   : > { %v630_v4 = vpop.f32.mrb[22].mxu1 }
 0x1f4   : > { %v631_v5 = vadd.f32 %v1404_v19, %v630_v4  ;;  %v1034_v6 = vpop.f32.mrb[23].mxu1  ;;  %v651_v7 = vmax.f32 %v628_v2, 0.0 }
 0x1f6   : > { %v652_v8 = vmax.f32 %v631_v5, 0.0 }
 0x1f8   : > { %v659_v9 = vpack.c.bf16 %v652_v8, %v651_v7 }
 0x1f9   : > { %v635_v10 = vpop.f32.mrb[24].mxu1 }
 0x1fa   : > { %v636_v11 = vadd.f32 %v1404_v19, %v635_v10  ;;  %679 = vxpose.xlu0.c.b16.cont [6/7] (short) (narrow) %v659_v9, 32  ;;  %v1037_v13 = vpop.f32.mrb[25].mxu1  ;;  %v789_v19 = vld [vmem:[%s1413_s19] sm:$0xff] }
 0x1fb   : > { %v638_v12 = vpop.f32.mrb[26].mxu1 }
 0x1fc   : > { %v653_v14 = vmax.f32 %v636_v11, 0.0  ;;  %v1038_v15 = vpop.f32.mrb[27].mxu1 }
 0x1fe   : > { %v660_v16 = vpack.c.bf16 %v653_v14, %v653_v14 }
 0x200   : > { %680 = vxpose.xlu0.c.b16.end [7/7] (short) (narrow) %v660_v16, 32 }
 0x24e   : > { %v682_v17 = vpop.trf.xlu0 }
 0x24f   : > { %1053 = vmatprep.mubr.msk.bf16.mxu0 %vm729_vm4, %v682_v17 }
 0x252   : > { %v683_v18 = vpop.trf.xlu0 }
 0x253   : > { %1054 = vmatmul.mubr.msk.bf16.vlgmr.msra.gmra.mrb[28].mxu0 %vm729_vm4, %v683_v18 }
 0x326   : > { %v1055_v21 = vpop.f32.mrb[28].mxu0 }
 0x327   : > { %v795_v23 = vadd.f32 %v1055_v21, %v791_v20  ;;  %v774_v24 = vpop.f32.mrb[29].mxu0 }
 0x328   : > { %v793_v26 = vadd.f32 %v789_v19, %v774_v24  ;;  %v1056_v27 = vpop.f32.mrb[30].mxu0 }
 0x329   : > { %800 = vst.msk [vmem:[%s1413_s19 + $0x10] sm:$0xff] %vm305_vm3, %v795_v23  ;;  %v796_v28 = vadd.f32 %v1056_v27, %v792_v22  ;;  %v777_v29 = vpop.f32.mrb[31].mxu0 }
 0x32a   : > { %798 = vst.msk [vmem:[%s1413_s19] sm:$0xff] %vm305_vm3, %v793_v26  ;;  %v794_v30 = vadd.f32 %v790_v25, %v777_v29 }
 0x32b   : > { %801 = vst.msk [vmem:[%s1413_s19 + $0x18] sm:$0xff] %vm305_vm3, %v796_v28 }
 0x32c   : > { %799 = vst.msk [vmem:[%s1413_s19 + $0x8] sm:$0xff] %vm305_vm3, %v794_v30 }
 0x32d   : > { %1149 = shalt.err (!%p1146_p5)
}
 0x32e   : > { %s1150_s15 = scalar_lea.hbm %s1447_s8, 512  ;;  %s1154_s18 = scalar_lea.hbm %s1511_s6, 1024 }
 0x32f   : > { %p1151_p6 = scmp.ne.s32.totalorder %s1447_s8, %s1150_s15  ;;  %p1155_p10 = scmp.lt.u32.totalorder %s1447_s8, %s1511_s6 }
 0x330   : > { %p1156_p11 = scmp.lt.u32.totalorder %s1154_s18, %s1150_s15  ;;  %p1158_p13 = scmp.lt.u32.totalorder %s1150_s15, %s1447_s8 }
 0x331   : > { %p1152_p7 = pnand %p1151_p6, %p1296_p4 }
 0x332   : > { %p1157_p12 = por %p1156_p11, %p1155_p10 }
 0x333   : > { %p1153_p9 = pneg %p1152_p7 }
 0x334   : > { %p1159_p0 = por %p1158_p13, %p1157_p12 }
 0x336   : > { %p1160_p1 = pnand %p1159_p0, %p1153_p9 }
 0x338   : > { %1163 = shalt.err (!%p1160_p1)
}
 0x339   : > { %s1219_s28 = smov 128   ;;  %s1220_s30 = smov 8  }
 0x33a   : > { %1058 = dma.vmem_to_hbm [thread:$0]  (%p1296_p4), %s1449_s27, 512, %s1447_s8, %s1459_s24, %s1219_s28, %s1219_s28, %s1220_s30  }
 0x33b PF: > { %p1064_p2 = scmp.ge.s32.totalorder %s1214_s26, 2  ;;  %s831_s11 = sand.u32 1, %s1194_s21  }
 0x33c   : > { %s832_s12 = scalar_lea.sflag [#allocation3], %s831_s11 }
 0x33d   : > { %p1061_p3 = pnand %p1064_p2, %p1303_p8 }
 0x33f   : > { %1189 = dma.done.wait (!%p1061_p3), %s832_s12, 512  }
 0x340   : > { %1191 = vsyncadd (!%p1061_p3), %s832_s12, 4294966784  ;;  %s19_s26 = sadd.s32 1, %s1214_s26   ;;  %s1514_s21 = smov %s1198_s22 }
 0x341   : > { %p16_p5 = scmp.ge.s32.totalorder %s19_s26, 4   ;;  %s1515_s22 = smov %s1202_s23 }
 0x342   : > { %s1516_s23 = smov %s1309_s10  ;;  %s1517_s24 = smov %s1210_s25 }
 0x343   : > { %s1518_s25 = smov %s1520_s29  ;;  %18 = sbr.rel (!%p16_p5) target bundleno = 4 (0x4), region = 86 }
 0x34a   :  { %837 = vsyncpa [#allocation3], 1 }
 0x34b   :  { %839 = vsyncpa [#allocation3 + $0x1], 1 }

</bundles_post_ra>
